<compile_context>
chip_gen: v7x
topology: tpu7x:2x2x1
jax: 0.10.0
libtpu: 0.0.40
codegen_flags: <defaults>
</compile_context>

<pallas_src>
import jax
import jax.numpy as jnp
from jax.experimental import pallas as pl
from jax.experimental.pallas import tpu as pltpu

H1 = 256
H2 = 128
H3_REAL = 64
H3 = 128  # fc3 output (= fc4 input) zero-padded 64 -> 128 for lane density


def _round_up(x, m):
    return (x + m - 1) // m * m


def _device_kind():
    try:
        return jax.devices()[0].device_kind.lower()
    except Exception:
        return ""


def _vmem_capacity_bytes():
    try:
        return int(pltpu.get_tpu_info().vmem_capacity_bytes)
    except Exception:
        return 64 * 1024 * 1024  # conservative fallback (v7x per-TC VMEM)


def _make_kernel(tm, bf16_elementwise):
    """Build the fused critic kernel for a given batch tile tm (mult of 128)."""
    assert tm % 128 == 0
    g_tiles = tm // 128

    def relu_cast(h):
        # ReLU commutes with round-to-nearest, so bf16-first is numerically
        # identical to f32-relu-then-cast; bf16 halves VALU/vreg traffic on
        # v6e/v7x.  Keep the f32 path on v5e (no bf16 VALU).
        if bf16_elementwise:
            return jnp.maximum(h.astype(jnp.bfloat16), 0.0)
        return jnp.maximum(h, 0.0).astype(jnp.bfloat16)

    def kernel(x_ref, w1_ref, b1_ref, w2_ref, b2_ref, w3_ref, b3_ref,
               w4_ref, b4_ref, o_ref):
        x = x_ref[...]                                     # (tm, S+A) bf16

        # fc1: single K=(S+A) matmul, f32 accumulation + f32 bias.
        h1 = jnp.dot(x, w1_ref[...],
                     preferred_element_type=jnp.float32) + b1_ref[...]
        h1 = relu_cast(h1)
        # TODO(synk): Dropout(p=0.2) training-mode mask not implemented
        # (eval-mode identity).

        # fc2
        h2 = jnp.dot(h1, w2_ref[...],
                     preferred_element_type=jnp.float32) + b2_ref[...]
        h2 = relu_cast(h2)
        # dropout(p=0.2) eval mode -> identity

        # fc3 (output padded 64 -> 128 lanes; padded lanes are exactly 0)
        h3 = jnp.dot(h2, w3_ref[...],
                     preferred_element_type=jnp.float32) + b3_ref[...]
        h3 = relu_cast(h3)                                 # (tm, 128) bf16

        # fc4 (64 -> 1, padded to 128): per 128-row group compute
        #   w4 (1,128) . h3_tile (128,128)^T  ->  (1,128)
        # which is already lane-dense, then store that full-lane row.  This
        # avoids both an N=1 MXU matmul and masked single-lane stores.
        w4 = w4_ref[...]                                   # (1, 128) bf16
        b4 = b4_ref[...]                                   # (1, 1)   f32
        for g in range(g_tiles):
            tile = h3[g * 128:(g + 1) * 128, :]            # (128, 128) bf16
            row = jax.lax.dot_general(
                w4, tile,
                dimension_numbers=(((1,), (1,)), ((), ())),
                preferred_element_type=jnp.float32)        # (1, 128) f32
            o_ref[pl.ds(g, 1), :] = (row + b4).astype(o_ref.dtype)

    return kernel


def pack_params(params):
    """Pad fc3/fc4 to 128 lanes; matmul weights in bf16, biases in f32."""
    (w1, b1), (w2, b2), (w3, b3), (w4, b4) = params
    pad3 = H3 - w3.shape[1]

    w1b = w1.astype(jnp.bfloat16)                                   # (S+A, 256)
    b1r = b1.reshape(1, -1).astype(jnp.float32)                     # (1, 256)
    w2b = w2.astype(jnp.bfloat16)                                   # (256, 128)
    b2r = b2.reshape(1, -1).astype(jnp.float32)                     # (1, 128)
    w3p = jnp.pad(w3, ((0, 0), (0, pad3))).astype(jnp.bfloat16)     # (128, 128)
    b3p = jnp.pad(b3, (0, pad3)).reshape(1, -1).astype(jnp.float32) # (1, 128)
    w4p = jnp.pad(w4.reshape(1, -1),
                  ((0, 0), (0, pad3))).astype(jnp.bfloat16)         # (1, 128)
    b4r = b4.reshape(1, 1).astype(jnp.float32)                      # (1, 1)
    return (w1b, b1r, w2b, b2r, w3p, b3p, w4p, b4r)


def critic_forward(state, action, params, *, tm=None):
    """state: (B, S), action: (B, A) -> q_value: (B, 1) float32."""
    B, S = state.shape
    A = action.shape[1]
    K = S + A
    packed = pack_params(params)

    # Batch tile: multiple of 128 (lane-dense output), up to 1024 rows/step so
    # per-grid-step fixed overhead (~0.35us) is amortized.
    if tm is None:
        tm = min(_round_up(B, 128), 1024)
    tm = max(128, _round_up(tm, 128))
    b_pad = _round_up(B, tm)
    n_steps = b_pad // tm

    # Concatenate state/action once and emit bf16 from the same producer pass
    # (single small write; kernel streams half the bytes vs f32).
    x = jnp.concatenate([state, action], axis=1).astype(jnp.bfloat16)
    if b_pad != B:
        x = jnp.pad(x, ((0, b_pad - B), (0, 0)))

    kind = _device_kind()
    is_v7 = ("v7" in kind) or ("tpu7" in kind)
    bf16_elementwise = ("v6" in kind) or is_v7   # v5e keeps f32 elementwise

    in_specs = [pl.BlockSpec((tm, K), lambda i: (i, 0))]          # streamed x
    in_specs += [pl.BlockSpec(p.shape, lambda i: (0, 0))          # resident W/b
                 for p in packed]
    # Lane-dense output slab: (b_pad//128, 128), one (tm//128, 128) block/step.
    out_specs = pl.BlockSpec((tm // 128, 128), lambda i: (i, 0))

    # Right-sized scoped VMEM: resident weights + double-buffered streamed
    # tiles + activation scratch, 2x headroom, capped per generation.
    resident = sum(int(p.size) * p.dtype.itemsize for p in packed)
    streamed = 2 * (tm * K * 2 + (tm // 128) * 128 * 4)
    acts = tm * (H1 + H2 + H3) * 4
    cap = min(48 * 1024 * 1024, _vmem_capacity_bytes() // 2)   # <=32 MiB on v7x
    vmem_limit = int(min(cap, max(16 * 1024 * 1024,
                                  2 * (resident + streamed + acts))))

    # v7x: only CORE_PARALLEL guarantees the batch axis is sharded across the
    # two TensorCores; plain "parallel" is used elsewhere.
    if is_v7 and n_steps % 2 == 0:
        dims = (pltpu.CORE_PARALLEL,)
    else:
        dims = (pltpu.PARALLEL,)

    out = pl.pallas_call(
        _make_kernel(tm, bf16_elementwise),
        out_shape=jax.ShapeDtypeStruct((b_pad // 128, 128), jnp.float32),
        grid=(n_steps,),
        in_specs=in_specs,
        out_specs=out_specs,
        compiler_params=pltpu.CompilerParams(
            dimension_semantics=dims,
            vmem_limit_bytes=vmem_limit),
    )(x, *packed)

    # Row-major flatten restores batch order; drop padded rows.
    return out.reshape(b_pad, 1)[:B]


def init_linear(key, fan_in, fan_out):
    # Deterministic init mimicking torch.nn.Linear default: U(+-1/sqrt(fan_in))
    kw, kb = jax.random.split(key)
    bound = 1.0 / jnp.sqrt(jnp.float32(fan_in))
    w = jax.random.uniform(kw, (fan_in, fan_out), jnp.float32, -bound, bound)
    b = jax.random.uniform(kb, (fan_out,), jnp.float32, -bound, bound)
    return w, b


def init_critic_params(key, global_state_dim, global_action_dim):
    in_dim = global_state_dim + global_action_dim
    k1, k2, k3, k4 = jax.random.split(key, 4)
    return (init_linear(k1, in_dim, 256),
            init_linear(k2, 256, 128),
            init_linear(k3, 128, 64),
            init_linear(k4, 64, 1))


def critic_reference(state, action, params):
    """Plain-JAX reference replicating the kernel math (bf16 matmul inputs,
    f32 accumulation / bias / final output)."""
    (w1, b1), (w2, b2), (w3, b3), (w4, b4) = params
    x = jnp.concatenate([state, action], axis=1)

    def bdot(a, w):
        return jnp.dot(a.astype(jnp.bfloat16), w.astype(jnp.bfloat16),
                       preferred_element_type=jnp.float32)

    h = jnp.maximum(bdot(x, w1) + b1, 0.0)
    h = jnp.maximum(bdot(h, w2) + b2, 0.0)
    h = jnp.maximum(bdot(h, w3) + b3, 0.0)
    return bdot(h, w4) + b4


if __name__ == "__main__":
    key = jax.random.PRNGKey(0)
    k_state, k_action, k_params = jax.random.split(key, 3)

    global_state_dim = 16
    global_action_dim = 16
    params = init_critic_params(k_params, global_state_dim, global_action_dim)

    # Primary small case (single grid step, single 128-row group).
    batch = 2
    state = jax.random.normal(k_state, (batch, global_state_dim), jnp.float32)
    action = jax.random.normal(k_action, (batch, global_action_dim), jnp.float32)

    q = critic_forward(state, action, params)
    q = jax.block_until_ready(q)
    assert q.shape == (batch, 1)
    q_ref = critic_reference(state, action, params)
    assert jnp.allclose(q, q_ref, atol=2e-3, rtol=2e-3), (
        f"mismatch: {q} vs {q_ref}")

    # Secondary case: batch not a multiple of 128 -> exercises padded rows and
    # multiple 128-row output groups within one tile.
    batch2 = 300
    state2 = jax.random.normal(k_state, (batch2, global_state_dim), jnp.float32)
    action2 = jax.random.normal(k_action, (batch2, global_action_dim), jnp.float32)
    q2 = jax.block_until_ready(critic_forward(state2, action2, params))
    q2_ref = critic_reference(state2, action2, params)
    assert q2.shape == (batch2, 1)
    assert jnp.allclose(q2, q2_ref, atol=2e-3, rtol=2e-3)

    print("KERNEL_OK")
</pallas_src>

<mosaic_0001>
module attributes {stable_mosaic.version = 11 : i64} {
  func.func @kernel(%arg0: i32, %arg1: memref<128x32xbf16, #tpu.memory_space<vmem>>, %arg2: memref<32x256xbf16, #tpu.memory_space<vmem>>, %arg3: memref<1x256xf32, #tpu.memory_space<vmem>>, %arg4: memref<256x128xbf16, #tpu.memory_space<vmem>>, %arg5: memref<1x128xf32, #tpu.memory_space<vmem>>, %arg6: memref<128x128xbf16, #tpu.memory_space<vmem>>, %arg7: memref<1x128xf32, #tpu.memory_space<vmem>>, %arg8: memref<1x128xbf16, #tpu.memory_space<vmem>>, %arg9: memref<1x1xf32, #tpu.memory_space<vmem>>, %arg10: memref<1x128xf32, #tpu.memory_space<vmem>>) attributes {dimension_semantics = [#tpu.dimension_semantics<parallel>], iteration_bounds = array<i64: 1>, scalar_prefetch = 0 : i64, scratch_operands = 0 : i64, tpu.core_type = #tpu.core_type<tc>, window_params = [{transform_indices = @transform_0, window_bounds = array<i64: 128, 32>}, {pipeline_mode = #tpu.pipeline_mode<synchronous>, transform_indices = @transform_1, window_bounds = array<i64: 32, 256>}, {pipeline_mode = #tpu.pipeline_mode<synchronous>, transform_indices = @transform_2, window_bounds = array<i64: 1, 256>}, {pipeline_mode = #tpu.pipeline_mode<synchronous>, transform_indices = @transform_3, window_bounds = array<i64: 256, 128>}, {pipeline_mode = #tpu.pipeline_mode<synchronous>, transform_indices = @transform_4, window_bounds = array<i64: 1, 128>}, {pipeline_mode = #tpu.pipeline_mode<synchronous>, transform_indices = @transform_5, window_bounds = array<i64: 128, 128>}, {pipeline_mode = #tpu.pipeline_mode<synchronous>, transform_indices = @transform_6, window_bounds = array<i64: 1, 128>}, {pipeline_mode = #tpu.pipeline_mode<synchronous>, transform_indices = @transform_7, window_bounds = array<i64: 1, 128>}, {pipeline_mode = #tpu.pipeline_mode<synchronous>, transform_indices = @transform_8, window_bounds = array<i64: 1, 1>}, {transform_indices = @transform_9, window_bounds = array<i64: 1, 128>}]} {
    %c0 = arith.constant 0 : index
    %c0_0 = arith.constant 0 : index
    %0 = vector.load %arg1[%c0, %c0_0] : memref<128x32xbf16, #tpu.memory_space<vmem>>, vector<128x32xbf16>
    %c0_1 = arith.constant 0 : index
    %c0_2 = arith.constant 0 : index
    %1 = vector.load %arg2[%c0_1, %c0_2] : memref<32x256xbf16, #tpu.memory_space<vmem>>, vector<32x256xbf16>
    %cst = arith.constant dense<0.000000e+00> : vector<128x256xf32>
    %2 = tpu.matmul %0, %1, %cst {dimension_numbers = #tpu.dot_dimension_numbers<[1], [0], [0], [1], [0, 0, 1, 1], [], []>} : vector<128x32xbf16>, vector<32x256xbf16>, vector<128x256xf32> -> vector<128x256xf32>
    %c0_3 = arith.constant 0 : index
    %c0_4 = arith.constant 0 : index
    %3 = vector.load %arg3[%c0_3, %c0_4] : memref<1x256xf32, #tpu.memory_space<vmem>>, vector<1x256xf32>
    %4 = vector.broadcast %3 : vector<1x256xf32> to vector<128x256xf32>
    %5 = arith.addf %2, %4 : vector<128x256xf32>
    %cst_5 = arith.constant 0.000000e+00 : f32
    %6 = vector.broadcast %cst_5 : f32 to vector<128x256xf32>
    %7 = arith.maximumf %5, %6 : vector<128x256xf32>
    %8 = arith.truncf %7 : vector<128x256xf32> to vector<128x256xbf16>
    %c0_6 = arith.constant 0 : index
    %c0_7 = arith.constant 0 : index
    %9 = vector.load %arg4[%c0_6, %c0_7] : memref<256x128xbf16, #tpu.memory_space<vmem>>, vector<256x128xbf16>
    %cst_8 = arith.constant dense<0.000000e+00> : vector<128x128xf32>
    %10 = tpu.matmul %8, %9, %cst_8 {dimension_numbers = #tpu.dot_dimension_numbers<[1], [0], [0], [1], [0, 0, 1, 1], [], []>} : vector<128x256xbf16>, vector<256x128xbf16>, vector<128x128xf32> -> vector<128x128xf32>
    %c0_9 = arith.constant 0 : index
    %c0_10 = arith.constant 0 : index
    %11 = vector.load %arg5[%c0_9, %c0_10] : memref<1x128xf32, #tpu.memory_space<vmem>>, vector<1x128xf32>
    %12 = vector.broadcast %11 : vector<1x128xf32> to vector<128x128xf32>
    %13 = arith.addf %10, %12 : vector<128x128xf32>
    %cst_11 = arith.constant 0.000000e+00 : f32
    %14 = vector.broadcast %cst_11 : f32 to vector<128x128xf32>
    %15 = arith.maximumf %13, %14 : vector<128x128xf32>
    %16 = arith.truncf %15 : vector<128x128xf32> to vector<128x128xbf16>
    %c0_12 = arith.constant 0 : index
    %c0_13 = arith.constant 0 : index
    %17 = vector.load %arg6[%c0_12, %c0_13] : memref<128x128xbf16, #tpu.memory_space<vmem>>, vector<128x128xbf16>
    %cst_14 = arith.constant dense<0.000000e+00> : vector<128x128xf32>
    %18 = tpu.matmul %16, %17, %cst_14 {dimension_numbers = #tpu.dot_dimension_numbers<[1], [0], [0], [1], [0, 0, 1, 1], [], []>} : vector<128x128xbf16>, vector<128x128xbf16>, vector<128x128xf32> -> vector<128x128xf32>
    %c0_15 = arith.constant 0 : index
    %c0_16 = arith.constant 0 : index
    %19 = vector.load %arg7[%c0_15, %c0_16] : memref<1x128xf32, #tpu.memory_space<vmem>>, vector<1x128xf32>
    %20 = vector.broadcast %19 : vector<1x128xf32> to vector<128x128xf32>
    %21 = arith.addf %18, %20 : vector<128x128xf32>
    %cst_17 = arith.constant 0.000000e+00 : f32
    %22 = vector.broadcast %cst_17 : f32 to vector<128x128xf32>
    %23 = arith.maximumf %21, %22 : vector<128x128xf32>
    %24 = arith.truncf %23 : vector<128x128xf32> to vector<128x128xbf16>
    %c0_18 = arith.constant 0 : index
    %c0_19 = arith.constant 0 : index
    %25 = vector.load %arg8[%c0_18, %c0_19] : memref<1x128xbf16, #tpu.memory_space<vmem>>, vector<1x128xbf16>
    %c0_20 = arith.constant 0 : index
    %c0_21 = arith.constant 0 : index
    %26 = vector.load %arg9[%c0_20, %c0_21] : memref<1x1xf32, #tpu.memory_space<vmem>>, vector<1x1xf32>
    %cst_22 = arith.constant dense<0.000000e+00> : vector<1x128xf32>
    %27 = tpu.matmul %25, %24, %cst_22 {dimension_numbers = #tpu.dot_dimension_numbers<[1], [1], [0], [0], [0, 0, 1, 0], [], []>} : vector<1x128xbf16>, vector<128x128xbf16>, vector<1x128xf32> -> vector<1x128xf32>
    %28 = vector.broadcast %26 : vector<1x1xf32> to vector<1x128xf32>
    %29 = arith.addf %27, %28 : vector<1x128xf32>
    %c0_23 = arith.constant 0 : index
    %c0_24 = arith.constant 0 : index
    %30 = vector.load %arg10[%c0_23, %c0_24] : memref<1x128xf32, #tpu.memory_space<vmem>>, vector<1x128xf32>
    tpu.vector_store %arg10[%c0_23, %c0_24], %29 {strides = array<i32>} : memref<1x128xf32, #tpu.memory_space<vmem>>, vector<1x128xf32>,
    return
  }
  func.func @transform_0(%arg0: i32) -> (i32, i32) {
    %c0_i32 = arith.constant 0 : i32
    %c0_i32_0 = arith.constant 0 : i32
    return %arg0, %c0_i32 : i32, i32
  }
  func.func @transform_1(%arg0: i32) -> (i32, i32) {
    %c0_i32 = arith.constant 0 : i32
    %c0_i32_0 = arith.constant 0 : i32
    %c0_i32_1 = arith.constant 0 : i32
    return %c0_i32, %c0_i32_0 : i32, i32
  }
  func.func @transform_2(%arg0: i32) -> (i32, i32) {
    %c0_i32 = arith.constant 0 : i32
    %c0_i32_0 = arith.constant 0 : i32
    %c0_i32_1 = arith.constant 0 : i32
    return %c0_i32, %c0_i32_0 : i32, i32
  }
  func.func @transform_3(%arg0: i32) -> (i32, i32) {
    %c0_i32 = arith.constant 0 : i32
    %c0_i32_0 = arith.constant 0 : i32
    %c0_i32_1 = arith.constant 0 : i32
    return %c0_i32, %c0_i32_0 : i32, i32
  }
  func.func @transform_4(%arg0: i32) -> (i32, i32) {
    %c0_i32 = arith.constant 0 : i32
    %c0_i32_0 = arith.constant 0 : i32
    %c0_i32_1 = arith.constant 0 : i32
    return %c0_i32, %c0_i32_0 : i32, i32
  }
  func.func @transform_5(%arg0: i32) -> (i32, i32) {
    %c0_i32 = arith.constant 0 : i32
    %c0_i32_0 = arith.constant 0 : i32
    %c0_i32_1 = arith.constant 0 : i32
    return %c0_i32, %c0_i32_0 : i32, i32
  }
  func.func @transform_6(%arg0: i32) -> (i32, i32) {
    %c0_i32 = arith.constant 0 : i32
    %c0_i32_0 = arith.constant 0 : i32
    %c0_i32_1 = arith.constant 0 : i32
    return %c0_i32, %c0_i32_0 : i32, i32
  }
  func.func @transform_7(%arg0: i32) -> (i32, i32) {
    %c0_i32 = arith.constant 0 : i32
    %c0_i32_0 = arith.constant 0 : i32
    %c0_i32_1 = arith.constant 0 : i32
    return %c0_i32, %c0_i32_0 : i32, i32
  }
  func.func @transform_8(%arg0: i32) -> (i32, i32) {
    %c0_i32 = arith.constant 0 : i32
    %c0_i32_0 = arith.constant 0 : i32
    %c0_i32_1 = arith.constant 0 : i32
    return %c0_i32, %c0_i32_0 : i32, i32
  }
  func.func @transform_9(%arg0: i32) -> (i32, i32) {
    %c0_i32 = arith.constant 0 : i32
    %c0_i32_0 = arith.constant 0 : i32
    return %arg0, %c0_i32 : i32, i32
  }
}

</mosaic_0001>

<bundles_post_ra>
// kernel: tpu_custom_call.1
= control target key start
LH: loop header
LB: loop body
LE: loop exit
PB: predicated region body
PF: predicated region fallthrough
CT: control target
= control target key end

     0   :  { %s1359_s0 = inlined_call_operand.vmem [shape: bf16[128,32], index: 0, kind: input, shape index: {}]   ;;  %s1360_s1 = inlined_call_operand.vmem [shape: bf16[32,256], index: 1, kind: input, shape index: {}]   ;;  %s1361_s2 = inlined_call_operand.vmem [shape: f32[1,256], index: 2, kind: input, shape index: {}]   ;;  %s1362_s3 = inlined_call_operand.hbm [shape: bf16[256,128], index: 3, kind: input, shape index: {}]   ;;  %s1363_s4 = inlined_call_operand.vmem [shape: f32[1,128], index: 4, kind: input, shape index: {}]   ;;  %s1364_s5 = inlined_call_operand.vmem [shape: bf16[128,128], index: 5, kind: input, shape index: {}]   ;;  %s1365_s6 = inlined_call_operand.vmem [shape: f32[1,128], index: 6, kind: input, shape index: {}]   ;;  %s1366_s7 = inlined_call_operand.vmem [shape: bf16[1,128], index: 7, kind: input, shape index: {}]   ;;  %s1367_s8 = inlined_call_operand.<no memory space> [shape: f32[1,1], index: 8, kind: input, shape index: {}]   ;;  %s1368_s9 = inlined_call_operand.hbm [shape: f32[1,128], index: 9, kind: output, shape index: {}]  }
   0x1   :  { %v14_v0 = vstv %s1367_s8 }
   0x2   :  { %15 = vst [vmem:[#allocation2] sm:$0x1] %v14_v0 }
   0x3   :  { %16 = vsyncpa [#allocation4], 0 }
   0x4   :  { %17 = vsyncpa [#allocation5], 0  ;;  %s1124_s11 = smov [#allocation3]   ;;  %s1076_s15 = scalar_lea.hbm %s1362_s3, 2048 }
   0x5   :  { %s29_s12 = sshll.u32 %s1124_s11, 4  ;;  %p1077_p0 = scmp.ne.s32.totalorder %s1362_s3, %s1076_s15  ;;  %s30_s12 = int_to_ptr.vmem [resolvable:$true] %s29_s12 }
   0x6   :  { %p1080_p1 = scmp.lt.u32.totalorder %s1076_s15, %s1362_s3 }
   0x8   :  { %p1082_p2 = pnand %p1080_p1, %p1077_p0 }
   0xa   :  { %1085 = shalt.err (!%p1082_p2)
}
   0xb   :  { %s1086_s8 = scalar_lea.vmem %s30_s12, 2048  ;;  %p1091_p4 = scmp.lt.s32.totalorder %s30_s12, %s30_s12 }
   0xc   :  { %p1087_p3 = scmp.ne.s32.totalorder %s30_s12, %s1086_s8  ;;  %p1092_p5 = scmp.lt.s32.totalorder %s1086_s8, %s1086_s8 }
   0xe   :  { %p1093_p6 = por %p1092_p5, %p1091_p4 }
  0x10   :  { %p1094_p7 = pnand %p1093_p6, %p1087_p3 }
  0x12   :  { %1097 = shalt.err (!%p1094_p7)
}
  0x13   :  { %s1125_s20 = smov 64   ;;  %s1126_s21 = smov 4  }
  0x14   :  { %35 = dma.hbm_to_vmem [thread:$0]  %s1362_s3, 2048, %s30_s12, [#allocation4], %s1125_s20, %s1125_s20, %s1126_s21  }
  0x15   :  { %1120 = dma.done.wait [#allocation4], 2048  }
  0x16   :  { %1121 = vsyncadd [#allocation4], 4294965248  ;;  %v1127_v1 = vmov 0   ;;  %v1038_v2 = vld [vmem:[%s1360_s1 + $0x4] ss:$8 sps:$4 sm:$0xff]   ;;  %vm142_vm0 = vcmask 261120   ;;  %v72_v36 = vlaneseq }
  0x17   :  { %199 = vmatprep.mubr.bf16.mxu0 %v1127_v1  ;;  %1037 = vset.pattern.permute.xlu0 %v1127_v1  ;;  %v1040_v3 = vld [vmem:[%s1360_s1] ss:$8 sps:$4 sm:$0xff]   ;;  %v1041_v4 = vld [vmem:[%s1360_s1 + $0x14] ss:$8 sps:$4 sm:$0xff]   ;;  %v1043_v5 = vld [vmem:[%s1360_s1 + $0x10] ss:$8 sps:$4 sm:$0xff]  }
  0x18   :  { %167 = vmatprep.subr.bf16.mxu0 %v1038_v2  ;;  %v1044_v6 = vld [vmem:[%s1359_s0] sm:$0xff]   ;;  %v1045_v8 = vld [vmem:[%s1359_s0 + $0x8] sm:$0xff]   ;;  %v1056_v12 = vld [vmem:[#allocation3 + $0x50] sm:$0xff]   ;;  %v1258_v37 = vshrl.u32 %v72_v36, 7  ;;  %vm1129_vm1 = vmmov 0   ;;  %s1130_s8 = smov [#allocation6]  }
  0x19   :  { %168 = vmatpush1.bf16.msra.mxu0 %v1040_v3  ;;  %v1052_v7 = vld [vmem:[#allocation3 + $0x40] sm:$0xff]   ;;  %v1054_v10 = vld [vmem:[#allocation3 + $0x48] sm:$0xff]   ;;  %v1057_v13 = vld [vmem:[#allocation3 + $0x10] sm:$0xff]   ;;  %s834_s20 = sshll.u32 %s1130_s8, 4  ;;  %s835_s20 = int_to_ptr.vmem [resolvable:$true] %s834_s20 }
  0x1a   :  { %169 = vmatprep.subr.bf16.mxu0 %v1041_v4  ;;  %v1053_v9 = vld [vmem:[#allocation3] sm:$0xff]   ;;  %889 = vmatprep.subr.bf16.mxu1 %v1052_v7  ;;  %v1055_v11 = vld [vmem:[#allocation3 + $0x8] sm:$0xff]   ;;  %v1058_v14 = vld [vmem:[#allocation3 + $0x58] sm:$0xff]   ;;  %v74_v38 = vsub.s32 0, %v1258_v37  ;;  %v78_v40 = vsub.s32 1, %v1258_v37  ;;  %s1098_s21 = scalar_lea.vmem %s835_s20, 16  ;;  %p1103_p9 = scmp.lt.s32.totalorder %s835_s20, %s835_s20 }
  0x1b   :  { %890 = vmatpush3.bf16.msra.mxu1 %v1053_v9  ;;  %v1046_v15 = vld [vmem:[%s1359_s0 + $0x10] sm:$0xff]   ;;  %v1059_v16 = vld [vmem:[#allocation3 + $0x18] sm:$0xff]   ;;  %v1060_v17 = vld [vmem:[#allocation3 + $0x60] sm:$0xff]   ;;  %p1099_p8 = scmp.ne.s32.totalorder %s835_s20, %s1098_s21  ;;  %s1102_s22 = scalar_lea.vmem %s835_s20, 32 }
  0x1c   :  { %891 = vmatprep.subr.bf16.mxu1 %v1054_v10  ;;  %v1061_v18 = vld [vmem:[#allocation3 + $0x20] sm:$0xff]   ;;  %v1062_v19 = vld [vmem:[#allocation3 + $0x68] sm:$0xff]   ;;  %v1047_v20 = vld [vmem:[%s1359_s0 + $0x18] sm:$0xff]   ;;  %p1104_p10 = scmp.lt.s32.totalorder %s1102_s22, %s1098_s21 }
  0x1d   :  { %170 = vmatpush1.bf16.msra.mxu0 %v1043_v5  ;;  %v1048_v21 = vld [vmem:[%s1359_s0 + $0x20] sm:$0xff]   ;;  %v1049_v22 = vld [vmem:[%s1359_s0 + $0x28] sm:$0xff]   ;;  %v1050_v23 = vld [vmem:[%s1359_s0 + $0x30] sm:$0xff]  }
  0x1e   :  { %v1051_v24 = vld [vmem:[%s1359_s0 + $0x38] sm:$0xff]   ;;  %v1063_v25 = vld [vmem:[#allocation3 + $0x28] sm:$0xff]   ;;  %v1068_v30 = vld [vmem:[%s1364_s5] sm:$0xff]   ;;  %p1105_p11 = por %p1104_p10, %p1103_p9 }
  0x1f   :  { %892 = vmatpush3.bf16.msra.mxu1 %v1055_v11  ;;  %v1064_v26 = vld [vmem:[#allocation3 + $0x70] sm:$0xff]   ;;  %v1066_v28 = vld [vmem:[#allocation3 + $0x78] sm:$0xff]   ;;  %v1069_v31 = vld [vmem:[%s1364_s5 + $0x8] sm:$0xff]   ;;  %978 = vmatprep.subr.bf16.mxu0 %v1068_v30 }
  0x20   :  { %855 = vmatmul.mubr.msk.bf16.vlgmr.msra.gmra.mrb[0].mxu0 %vm142_vm0, %v1044_v6  ;;  %893 = vmatprep.subr.bf16.mxu1 %v1056_v12  ;;  %v1065_v27 = vld [vmem:[#allocation3 + $0x30] sm:$0xff]   ;;  %v1067_v29 = vld [vmem:[#allocation3 + $0x38] sm:$0xff]   ;;  %v1073_v35 = vld [vmem:[%s1364_s5 + $0x28] sm:$0xff]   ;;  %p1106_p12 = pnand %p1105_p11, %p1099_p8 }
  0x21   :  { %209 = vmatprep.mubr.bf16.mxu0 %v1127_v1  ;;  %979 = vmatpush3.bf16.msra.mxu0 %v1068_v30  ;;  %v1070_v32 = vld [vmem:[%s1364_s5 + $0x10] sm:$0xff]   ;;  %v1071_v33 = vld [vmem:[%s1364_s5 + $0x18] sm:$0xff]   ;;  %v1072_v34 = vld [vmem:[%s1364_s5 + $0x20] sm:$0xff]  }
  0x22   :  { %980 = vmatprep.subr.bf16.mxu0 %v1069_v31  ;;  %v70_v39 = vld [vmem:[%s1361_s2] sm:$0x3] }
  0x23   :  { %894 = vmatpush3.bf16.msra.mxu1 %v1057_v13  ;;  %v1267_v41 = vrot.slane %v70_v39, %v74_v38  ;;  %v1269_v42 = vrot.slane %v70_v39, %v78_v40 }
  0x24   :  { %895 = vmatprep.subr.bf16.mxu1 %v1058_v14 }
  0x25   :  { %981 = vmatpush3.bf16.msra.mxu0 %v1069_v31 }
  0x26   :  { %982 = vmatprep.subr.bf16.mxu0 %v1070_v32 }
  0x27   :  { %896 = vmatpush3.bf16.msra.mxu1 %v1059_v16 }
  0x28   :  { %856 = vmatmul.mubr.msk.bf16.gmra.mrb[4].mxu0 %vm142_vm0, %v1045_v8  ;;  %897 = vmatprep.subr.bf16.mxu1 %v1060_v17 }
  0x29   :  { %219 = vmatprep.mubr.bf16.mxu0 %v1127_v1  ;;  %983 = vmatpush3.bf16.msra.mxu0 %v1070_v32 }
  0x2a   :  { %984 = vmatprep.subr.bf16.mxu0 %v1071_v33 }
  0x2b   :  { %898 = vmatpush3.bf16.msra.mxu1 %v1061_v18 }
  0x2c   :  { %899 = vmatprep.subr.bf16.mxu1 %v1062_v19 }
  0x2d   :  { %985 = vmatpush3.bf16.msra.mxu0 %v1071_v33 }
  0x2e   :  { %986 = vmatprep.subr.bf16.mxu0 %v1072_v34 }
  0x2f   :  { %900 = vmatpush3.bf16.msra.mxu1 %v1063_v25 }
  0x30   :  { %857 = vmatmul.mubr.msk.bf16.gmra.mrb[8].mxu0 %vm142_vm0, %v1046_v15  ;;  %901 = vmatprep.subr.bf16.mxu1 %v1064_v26 }
  0x31   :  { %229 = vmatprep.mubr.bf16.mxu0 %v1127_v1  ;;  %987 = vmatpush3.bf16.msra.mxu0 %v1072_v34 }
  0x32   :  { %988 = vmatprep.subr.bf16.mxu0 %v1073_v35 }
  0x33   :  { %902 = vmatpush3.bf16.msra.mxu1 %v1065_v27 }
  0x34   :  { %903 = vmatprep.subr.bf16.mxu1 %v1066_v28 }
  0x35   :  { %989 = vmatpush3.bf16.msra.mxu0 %v1073_v35 }
  0x37   :  { %904 = vmatpush3.bf16.msra.mxu1 %v1067_v29 }
  0x38   :  { %858 = vmatmul.mubr.msk.bf16.gmra.mrb[12].mxu0 %vm142_vm0, %v1047_v20 }
  0x39   :  { %239 = vmatprep.mubr.bf16.mxu0 %v1127_v1 }
  0x40   :  { %859 = vmatmul.mubr.msk.bf16.gmra.mrb[16].mxu0 %vm142_vm0, %v1048_v21 }
  0x41   :  { %249 = vmatprep.mubr.bf16.mxu0 %v1127_v1 }
  0x48   :  { %860 = vmatmul.mubr.msk.bf16.gmra.mrb[20].mxu0 %vm142_vm0, %v1049_v22 }
  0x49   :  { %259 = vmatprep.mubr.bf16.mxu0 %v1127_v1 }
  0x50   :  { %861 = vmatmul.mubr.msk.bf16.gmra.mrb[24].mxu0 %vm142_vm0, %v1050_v23 }
  0x51   :  { %269 = vmatprep.mubr.bf16.mxu0 %v1127_v1 }
  0x58   :  { %862 = vmatmul.mubr.msk.bf16.gmra.mrb[28].mxu0 %vm142_vm0, %v1051_v24 }
  0xf3   :  { %v201_v43 = vpop.f32.mrb[0].mxu0 }
  0xf4   :  { %v202_v44 = vadd.f32 %v201_v43, %v1267_v41  ;;  %v203_v45 = vpop.f32.mrb[1].mxu0 }
  0xf5   :  { %v204_v46 = vadd.f32 %v203_v45, %v1269_v42  ;;  %v205_v47 = vpop.f32.mrb[2].mxu0 }
  0xf6   :  { %v206_v48 = vadd.f32 %v205_v47, %v1267_v41  ;;  %v207_v49 = vpop.f32.mrb[3].mxu0  ;;  %v280_v51 = vmax.f32 %v202_v44, 0.0 }
  0xf7   :  { %v208_v50 = vadd.f32 %v207_v49, %v1269_v42  ;;  %v281_v53 = vmax.f32 %v204_v46, 0.0 }
  0xf8   :  { %v282_v52 = vmax.f32 %v206_v48, 0.0 }
  0xf9   :  { %v283_v54 = vmax.f32 %v208_v50, 0.0 }
  0xfa   :  { %v312_v55 = vpack.c.bf16 %v282_v52, %v280_v51 }
  0xfb   :  { %v211_v56 = vpop.f32.mrb[4].mxu0  ;;  %v313_v57 = vpack.c.bf16 %v283_v54, %v281_v53 }
  0xfc   :  { %v212_v58 = vadd.f32 %v211_v56, %v1267_v41  ;;  %v213_v59 = vpop.f32.mrb[5].mxu0 }
  0xfd   :  { %v214_v60 = vadd.f32 %v213_v59, %v1269_v42  ;;  %v215_v61 = vpop.f32.mrb[6].mxu0  ;;  %495 = vmatprep.mubr.bf16.mxu1 %v313_v57 }
  0xfe   :  { %v216_v62 = vadd.f32 %v215_v61, %v1267_v41  ;;  %v217_v63 = vpop.f32.mrb[7].mxu0  ;;  %496 = vmatmul.mubr.bf16.vlgmr.msra.gmra.mrb[0].mxu1 %v312_v55  ;;  %v284_v1 = vmax.f32 %v212_v58, 0.0 }
  0xff   :  { %v218_v0 = vadd.f32 %v217_v63, %v1269_v42  ;;  %v285_v3 = vmax.f32 %v214_v60, 0.0 }
 0x100   :  { %v286_v2 = vmax.f32 %v216_v62, 0.0 }
 0x101   :  { %v287_v4 = vmax.f32 %v218_v0, 0.0 }
 0x102   :  { %v314_v5 = vpack.c.bf16 %v286_v2, %v284_v1 }
 0x103   :  { %v315_v6 = vpack.c.bf16 %v287_v4, %v285_v3  ;;  %v221_v7 = vpop.f32.mrb[8].mxu0 }
 0x104   :  { %v222_v8 = vadd.f32 %v221_v7, %v1267_v41  ;;  %v223_v9 = vpop.f32.mrb[9].mxu0 }
 0x105   :  { %v224_v10 = vadd.f32 %v223_v9, %v1269_v42  ;;  %v225_v11 = vpop.f32.mrb[10].mxu0  ;;  %503 = vmatprep.mubr.bf16.mxu1 %v315_v6 }
 0x106   :  { %v226_v12 = vadd.f32 %v225_v11, %v1267_v41  ;;  %v227_v13 = vpop.f32.mrb[11].mxu0  ;;  %504 = vmatmul.mubr.bf16.gmra.mrb[4].mxu1 %v314_v5  ;;  %v288_v15 = vmax.f32 %v222_v8, 0.0 }
 0x107   :  { %v228_v14 = vadd.f32 %v227_v13, %v1269_v42  ;;  %v289_v17 = vmax.f32 %v224_v10, 0.0 }
 0x108   :  { %v290_v16 = vmax.f32 %v226_v12, 0.0 }
 0x109   :  { %v291_v18 = vmax.f32 %v228_v14, 0.0 }
 0x10a   :  { %v316_v19 = vpack.c.bf16 %v290_v16, %v288_v15 }
 0x10b   :  { %v317_v20 = vpack.c.bf16 %v291_v18, %v289_v17  ;;  %v231_v21 = vpop.f32.mrb[12].mxu0 }
 0x10c   :  { %v232_v22 = vadd.f32 %v231_v21, %v1267_v41  ;;  %v233_v23 = vpop.f32.mrb[13].mxu0 }
 0x10d   :  { %v234_v24 = vadd.f32 %v233_v23, %v1269_v42  ;;  %v235_v25 = vpop.f32.mrb[14].mxu0  ;;  %511 = vmatprep.mubr.bf16.mxu1 %v317_v20 }
 0x10e   :  { %v236_v26 = vadd.f32 %v235_v25, %v1267_v41  ;;  %v237_v27 = vpop.f32.mrb[15].mxu0  ;;  %512 = vmatmul.mubr.bf16.gmra.mrb[8].mxu1 %v316_v19  ;;  %v292_v29 = vmax.f32 %v232_v22, 0.0 }
 0x10f   :  { %v238_v28 = vadd.f32 %v237_v27, %v1269_v42  ;;  %v293_v31 = vmax.f32 %v234_v24, 0.0 }
 0x110   :  { %v294_v30 = vmax.f32 %v236_v26, 0.0 }
 0x111   :  { %v295_v32 = vmax.f32 %v238_v28, 0.0 }
 0x112   :  { %v318_v33 = vpack.c.bf16 %v294_v30, %v292_v29 }
 0x113   :  { %v319_v34 = vpack.c.bf16 %v295_v32, %v293_v31  ;;  %v241_v35 = vpop.f32.mrb[16].mxu0  ;;  %v1074_v31 = vld [vmem:[%s1364_s5 + $0x30] sm:$0xff]   ;;  %v1312_v32 = vld [vmem:[%s1363_s4] ss:$0 sm:$0xff] }
 0x114   :  { %v242_v36 = vadd.f32 %v241_v35, %v1267_v41  ;;  %v243_v39 = vpop.f32.mrb[17].mxu0  ;;  %990 = vmatprep.subr.bf16.mxu0 %v1074_v31 }
 0x115   :  { %v244_v40 = vadd.f32 %v243_v39, %v1269_v42  ;;  %v245_v43 = vpop.f32.mrb[18].mxu0  ;;  %519 = vmatprep.mubr.bf16.mxu1 %v319_v34  ;;  %991 = vmatpush3.bf16.msra.mxu0 %v1074_v31 }
 0x116   :  { %v246_v44 = vadd.f32 %v245_v43, %v1267_v41  ;;  %v247_v45 = vpop.f32.mrb[19].mxu0  ;;  %520 = vmatmul.mubr.bf16.gmra.mrb[12].mxu1 %v318_v33  ;;  %v296_v47 = vmax.f32 %v242_v36, 0.0 }
 0x117   :  { %v248_v46 = vadd.f32 %v247_v45, %v1269_v42  ;;  %v297_v49 = vmax.f32 %v244_v40, 0.0 }
 0x118   :  { %v298_v48 = vmax.f32 %v246_v44, 0.0 }
 0x119   :  { %v299_v50 = vmax.f32 %v248_v46, 0.0 }
 0x11a   :  { %v320_v51 = vpack.c.bf16 %v298_v48, %v296_v47 }
 0x11b   :  { %v321_v52 = vpack.c.bf16 %v299_v50, %v297_v49  ;;  %v251_v53 = vpop.f32.mrb[20].mxu0 }
 0x11c   :  { %v252_v54 = vadd.f32 %v251_v53, %v1267_v41  ;;  %v253_v55 = vpop.f32.mrb[21].mxu0 }
 0x11d   :  { %v254_v56 = vadd.f32 %v253_v55, %v1269_v42  ;;  %v255_v57 = vpop.f32.mrb[22].mxu0  ;;  %527 = vmatprep.mubr.bf16.mxu1 %v321_v52 }
 0x11e   :  { %v256_v58 = vadd.f32 %v255_v57, %v1267_v41  ;;  %v257_v59 = vpop.f32.mrb[23].mxu0  ;;  %528 = vmatmul.mubr.bf16.gmra.mrb[16].mxu1 %v320_v51  ;;  %v300_v61 = vmax.f32 %v252_v54, 0.0 }
 0x11f   :  { %v258_v60 = vadd.f32 %v257_v59, %v1269_v42  ;;  %v301_v63 = vmax.f32 %v254_v56, 0.0 }
 0x120   :  { %v302_v62 = vmax.f32 %v256_v58, 0.0 }
 0x121   :  { %v303_v0 = vmax.f32 %v258_v60, 0.0 }
 0x122   :  { %v322_v1 = vpack.c.bf16 %v302_v62, %v300_v61 }
 0x123   :  { %v323_v2 = vpack.c.bf16 %v303_v0, %v301_v63  ;;  %v261_v3 = vpop.f32.mrb[24].mxu0 }
 0x124   :  { %v262_v4 = vadd.f32 %v261_v3, %v1267_v41  ;;  %v263_v5 = vpop.f32.mrb[25].mxu0 }
 0x125   :  { %v264_v6 = vadd.f32 %v263_v5, %v1269_v42  ;;  %v265_v7 = vpop.f32.mrb[26].mxu0  ;;  %535 = vmatprep.mubr.bf16.mxu1 %v323_v2 }
 0x126   :  { %v266_v8 = vadd.f32 %v265_v7, %v1267_v41  ;;  %v267_v9 = vpop.f32.mrb[27].mxu0  ;;  %536 = vmatmul.mubr.bf16.gmra.mrb[20].mxu1 %v322_v1  ;;  %v304_v11 = vmax.f32 %v262_v4, 0.0 }
 0x127   :  { %v268_v10 = vadd.f32 %v267_v9, %v1269_v42  ;;  %v305_v13 = vmax.f32 %v264_v6, 0.0 }
 0x128   :  { %v306_v12 = vmax.f32 %v266_v8, 0.0 }
 0x129   :  { %v307_v14 = vmax.f32 %v268_v10, 0.0 }
 0x12a   :  { %v324_v15 = vpack.c.bf16 %v306_v12, %v304_v11 }
 0x12b   :  { %v325_v16 = vpack.c.bf16 %v307_v14, %v305_v13  ;;  %v271_v17 = vpop.f32.mrb[28].mxu0 }
 0x12c   :  { %v272_v18 = vadd.f32 %v271_v17, %v1267_v41  ;;  %v273_v19 = vpop.f32.mrb[29].mxu0 }
 0x12d   :  { %v274_v20 = vadd.f32 %v273_v19, %v1269_v42  ;;  %v275_v21 = vpop.f32.mrb[30].mxu0  ;;  %543 = vmatprep.mubr.bf16.mxu1 %v325_v16 }
 0x12e   :  { %v276_v22 = vadd.f32 %v275_v21, %v1267_v41  ;;  %v277_v23 = vpop.f32.mrb[31].mxu0  ;;  %544 = vmatmul.mubr.bf16.gmra.mrb[24].mxu1 %v324_v15  ;;  %v308_v25 = vmax.f32 %v272_v18, 0.0  ;;  %v1075_v41 = vld [vmem:[%s1364_s5 + $0x38] sm:$0xff]  }
 0x12f   :  { %v278_v24 = vadd.f32 %v277_v23, %v1269_v42  ;;  %v309_v27 = vmax.f32 %v274_v20, 0.0  ;;  %992 = vmatprep.subr.bf16.mxu0 %v1075_v41 }
 0x130   :  { %v310_v26 = vmax.f32 %v276_v22, 0.0  ;;  %993 = vmatpush3.bf16.msra.mxu0 %v1075_v41 }
 0x131   :  { %v311_v28 = vmax.f32 %v278_v24, 0.0 }
 0x132   :  { %v326_v29 = vpack.c.bf16 %v310_v26, %v308_v25 }
 0x133   :  { %v327_v30 = vpack.c.bf16 %v311_v28, %v309_v27 }
 0x135   :  { %551 = vmatprep.mubr.bf16.mxu1 %v327_v30 }
 0x136   :  { %552 = vmatmul.mubr.bf16.gmra.mrb[28].mxu1 %v326_v29 }
 0x1d1   :  { %v905_v42 = vpop.f32.mrb[0].mxu1 }
 0x1d2   :  { %v906_v33 = vpop.f32.mrb[1].mxu1 }
 0x1d3   :  { %v907_v34 = vadd.f32 %v906_v33, %v905_v42  ;;  %v908_v35 = vpop.f32.mrb[2].mxu1 }
 0x1d4   :  { %v909_v36 = vpop.f32.mrb[3].mxu1 }
 0x1d5   :  { %v498_v39 = vadd.f32 %v907_v34, %v1312_v32  ;;  %v910_v40 = vadd.f32 %v909_v36, %v908_v35 }
 0x1d7   :  { %v501_v43 = vadd.f32 %v910_v40, %v1312_v32  ;;  %v560_v44 = vmax.f32 %v498_v39, 0.0 }
 0x1d9   :  { %v561_v45 = vmax.f32 %v501_v43, 0.0  ;;  %v911_v46 = vpop.f32.mrb[4].mxu1 }
 0x1da   :  { %v912_v47 = vpop.f32.mrb[5].mxu1 }
 0x1db   :  { %v913_v48 = vadd.f32 %v912_v47, %v911_v46  ;;  %v914_v49 = vpop.f32.mrb[6].mxu1  ;;  %v576_v50 = vpack.c.bf16 %v561_v45, %v560_v44 }
 0x1dc   :  { %v915_v51 = vpop.f32.mrb[7].mxu1 }
 0x1dd   :  { %v506_v52 = vadd.f32 %v913_v48, %v1312_v32  ;;  %v916_v53 = vadd.f32 %v915_v51, %v914_v49  ;;  %994 = vmatprep.mubr.bf16.mxu0 %v576_v50 }
 0x1df   :  { %v509_v54 = vadd.f32 %v916_v53, %v1312_v32  ;;  %v562_v55 = vmax.f32 %v506_v52, 0.0 }
 0x1e1   :  { %v563_v56 = vmax.f32 %v509_v54, 0.0  ;;  %v917_v57 = vpop.f32.mrb[8].mxu1 }
 0x1e2   :  { %v918_v58 = vpop.f32.mrb[9].mxu1 }
 0x1e3   :  { %v577_v59 = vpack.c.bf16 %v563_v56, %v562_v55  ;;  %v919_v60 = vadd.f32 %v918_v58, %v917_v57  ;;  %v920_v61 = vpop.f32.mrb[10].mxu1 }
 0x1e4   :  { %v921_v62 = vpop.f32.mrb[11].mxu1 }
 0x1e5   :  { %v514_v63 = vadd.f32 %v919_v60, %v1312_v32  ;;  %v922_v0 = vadd.f32 %v921_v62, %v920_v61  ;;  %995 = vmatmul.mubr.bf16.vlgmr.msra.gmra.mrb[32].mxu0 %v577_v59 }
 0x1e7   :  { %v517_v1 = vadd.f32 %v922_v0, %v1312_v32  ;;  %v564_v2 = vmax.f32 %v514_v63, 0.0  ;;  %v1128_v63 = vmov 0.0   ;;  %v777_v0 = vld [vmem:[#allocation2] sm:$0x1] }
 0x1e8   :  { %1010 = vmatprep.subr.bf16.mxu1 %v1128_v63  ;;  %1026 = vmatprep.mubr.msk.bf16.mxu1 %vm1129_vm1, %v1128_v63 }
 0x1e9   :  { %v565_v3 = vmax.f32 %v517_v1, 0.0  ;;  %v923_v4 = vpop.f32.mrb[12].mxu1  ;;  %780 = vperm.xlu0 %1037, %v777_v0   ;;  %v880_v1 = vld [vmem:[%s1365_s6] ss:$0 sm:$0xff] }
 0x1ea   :  { %v924_v5 = vpop.f32.mrb[13].mxu1 }
 0x1eb   :  { %v925_v6 = vadd.f32 %v924_v5, %v923_v4  ;;  %v926_v7 = vpop.f32.mrb[14].mxu1  ;;  %v578_v8 = vpack.c.bf16 %v565_v3, %v564_v2 }
 0x1ec   :  { %v927_v9 = vpop.f32.mrb[15].mxu1 }
 0x1ed   :  { %v522_v10 = vadd.f32 %v925_v6, %v1312_v32  ;;  %v928_v11 = vadd.f32 %v927_v9, %v926_v7  ;;  %998 = vmatprep.mubr.bf16.mxu0 %v578_v8 }
 0x1ef   :  { %v525_v12 = vadd.f32 %v928_v11, %v1312_v32  ;;  %v566_v13 = vmax.f32 %v522_v10, 0.0 }
 0x1f1   :  { %v567_v14 = vmax.f32 %v525_v12, 0.0  ;;  %v929_v15 = vpop.f32.mrb[16].mxu1 }
 0x1f2   :  { %v930_v16 = vpop.f32.mrb[17].mxu1 }
 0x1f3   :  { %v931_v17 = vadd.f32 %v930_v16, %v929_v15  ;;  %v932_v18 = vpop.f32.mrb[18].mxu1  ;;  %v579_v19 = vpack.c.bf16 %v567_v14, %v566_v13 }
 0x1f4   :  { %v933_v20 = vpop.f32.mrb[19].mxu1 }
 0x1f5   :  { %v530_v21 = vadd.f32 %v931_v17, %v1312_v32  ;;  %v934_v22 = vadd.f32 %v933_v20, %v932_v18  ;;  %999 = vmatmul.mubr.bf16.gmra.mrb[36].mxu0 %v579_v19 }
 0x1f7   :  { %v533_v23 = vadd.f32 %v934_v22, %v1312_v32  ;;  %v568_v24 = vmax.f32 %v530_v21, 0.0 }
 0x1f9   :  { %v569_v25 = vmax.f32 %v533_v23, 0.0  ;;  %v935_v26 = vpop.f32.mrb[20].mxu1 }
 0x1fa   :  { %v936_v27 = vpop.f32.mrb[21].mxu1 }
 0x1fb   :  { %v937_v28 = vadd.f32 %v936_v27, %v935_v26  ;;  %v938_v29 = vpop.f32.mrb[22].mxu1  ;;  %v580_v30 = vpack.c.bf16 %v569_v25, %v568_v24 }
 0x1fc   :  { %v939_v31 = vpop.f32.mrb[23].mxu1 }
 0x1fd   :  { %v538_v41 = vadd.f32 %v937_v28, %v1312_v32  ;;  %v940_v42 = vadd.f32 %v939_v31, %v938_v29  ;;  %1002 = vmatprep.mubr.bf16.mxu0 %v580_v30 }
 0x1ff   :  { %v541_v33 = vadd.f32 %v940_v42, %v1312_v32  ;;  %v570_v34 = vmax.f32 %v538_v41, 0.0 }
 0x201   :  { %v571_v35 = vmax.f32 %v541_v33, 0.0  ;;  %v941_v36 = vpop.f32.mrb[24].mxu1 }
 0x202   :  { %v942_v39 = vpop.f32.mrb[25].mxu1 }
 0x203   :  { %v943_v40 = vadd.f32 %v942_v39, %v941_v36  ;;  %v944_v43 = vpop.f32.mrb[26].mxu1  ;;  %v581_v44 = vpack.c.bf16 %v571_v35, %v570_v34 }
 0x204   :  { %v945_v45 = vpop.f32.mrb[27].mxu1 }
 0x205   :  { %v546_v46 = vadd.f32 %v943_v40, %v1312_v32  ;;  %v946_v47 = vadd.f32 %v945_v45, %v944_v43  ;;  %1003 = vmatmul.mubr.bf16.gmra.mrb[40].mxu0 %v581_v44 }
 0x207   :  { %v549_v48 = vadd.f32 %v946_v47, %v1312_v32  ;;  %v572_v49 = vmax.f32 %v546_v46, 0.0 }
 0x209   :  { %v573_v50 = vmax.f32 %v549_v48, 0.0  ;;  %v947_v51 = vpop.f32.mrb[28].mxu1 }
 0x20a   :  { %v948_v52 = vpop.f32.mrb[29].mxu1 }
 0x20b   :  { %v949_v53 = vadd.f32 %v948_v52, %v947_v51  ;;  %v950_v54 = vpop.f32.mrb[30].mxu1  ;;  %v582_v55 = vpack.c.bf16 %v573_v50, %v572_v49 }
 0x20c   :  { %v951_v56 = vpop.f32.mrb[31].mxu1 }
 0x20d   :  { %v554_v57 = vadd.f32 %v949_v53, %v1312_v32  ;;  %v952_v58 = vadd.f32 %v951_v56, %v950_v54  ;;  %1006 = vmatprep.mubr.bf16.mxu0 %v582_v55 }
 0x20f   :  { %v557_v59 = vadd.f32 %v952_v58, %v1312_v32  ;;  %v574_v60 = vmax.f32 %v554_v57, 0.0 }
 0x211   :  { %v575_v61 = vmax.f32 %v557_v59, 0.0 }
 0x213   :  { %v583_v62 = vpack.c.bf16 %v575_v61, %v574_v60  ;;  %v776_v60 = vld [vmem:[%s1366_s7] sm:$0x1] }
 0x215   :  { %1007 = vmatmul.mubr.bf16.gmra.mrb[44].mxu0 %v583_v62 }
 0x268   :  { %v781_v61 = vpop.permute.xlu0 %780 }
 0x269   :  { %v786_v62 = vrot.slane %v781_v61, %v74_v38 }
 0x2b8   :  { %v996_v2 = vpop.f32.mrb[32].mxu0 }
 0x2b9   :  { %v698_v3 = vadd.f32 %v996_v2, %v880_v1  ;;  %v689_v4 = vpop.f32.mrb[33].mxu0 }
 0x2ba   :  { %v690_v32 = vadd.f32 %v880_v1, %v689_v4  ;;  %v997_v5 = vpop.f32.mrb[34].mxu0 }
 0x2bb   :  { %v701_v6 = vadd.f32 %v997_v5, %v880_v1  ;;  %v692_v7 = vpop.f32.mrb[35].mxu0  ;;  %v754_v9 = vmax.f32 %v698_v3, 0.0 }
 0x2bc   :  { %v693_v8 = vadd.f32 %v880_v1, %v692_v7  ;;  %v752_v11 = vmax.f32 %v690_v32, 0.0 }
 0x2bd   :  { %v755_v10 = vmax.f32 %v701_v6, 0.0 }
 0x2be   :  { %v753_v12 = vmax.f32 %v693_v8, 0.0 }
 0x2bf   :  { %v769_v13 = vpack.c.bf16 %v755_v10, %v754_v9 }
 0x2c0   :  { %v768_v14 = vpack.c.bf16 %v753_v12, %v752_v11 }
 0x2c2   :  { %1011 = vmatpush3.bf16.xpose.msra.mxu1 %v768_v14 }
 0x2c3   :  { %1012 = vmatprep.subr.bf16.mxu1 %v1128_v63 }
 0x2c8   :  { %v1000_v15 = vpop.f32.mrb[36].mxu0 }
 0x2c9   :  { %v714_v16 = vadd.f32 %v1000_v15, %v880_v1  ;;  %v705_v17 = vpop.f32.mrb[37].mxu0 }
 0x2ca   :  { %v706_v18 = vadd.f32 %v880_v1, %v705_v17  ;;  %v1001_v19 = vpop.f32.mrb[38].mxu0  ;;  %1013 = vmatpush3.bf16.xpose.msra.mxu1 %v769_v13 }
 0x2cb   :  { %v717_v20 = vadd.f32 %v1001_v19, %v880_v1  ;;  %v708_v21 = vpop.f32.mrb[39].mxu0  ;;  %1014 = vmatprep.subr.bf16.mxu1 %v1128_v63  ;;  %v758_v23 = vmax.f32 %v714_v16, 0.0 }
 0x2cc   :  { %v709_v22 = vadd.f32 %v880_v1, %v708_v21  ;;  %v756_v25 = vmax.f32 %v706_v18, 0.0 }
 0x2cd   :  { %v759_v24 = vmax.f32 %v717_v20, 0.0 }
 0x2ce   :  { %v757_v26 = vmax.f32 %v709_v22, 0.0 }
 0x2cf   :  { %v771_v27 = vpack.c.bf16 %v759_v24, %v758_v23 }
 0x2d0   :  { %v770_v28 = vpack.c.bf16 %v757_v26, %v756_v25 }
 0x2d2   :  { %1015 = vmatpush3.bf16.xpose.msra.mxu1 %v770_v28 }
 0x2d3   :  { %1016 = vmatprep.subr.bf16.mxu1 %v1128_v63 }
 0x2d8   :  { %v1004_v29 = vpop.f32.mrb[40].mxu0 }
 0x2d9   :  { %v730_v30 = vadd.f32 %v1004_v29, %v880_v1  ;;  %v721_v31 = vpop.f32.mrb[41].mxu0 }
 0x2da   :  { %v722_v41 = vadd.f32 %v880_v1, %v721_v31  ;;  %v1005_v42 = vpop.f32.mrb[42].mxu0  ;;  %1017 = vmatpush3.bf16.xpose.msra.mxu1 %v771_v27 }
 0x2db   :  { %v733_v33 = vadd.f32 %v1005_v42, %v880_v1  ;;  %v724_v34 = vpop.f32.mrb[43].mxu0  ;;  %1018 = vmatprep.subr.bf16.mxu1 %v1128_v63  ;;  %v762_v36 = vmax.f32 %v730_v30, 0.0 }
 0x2dc   :  { %v725_v35 = vadd.f32 %v880_v1, %v724_v34  ;;  %v760_v40 = vmax.f32 %v722_v41, 0.0 }
 0x2dd   :  { %v763_v39 = vmax.f32 %v733_v33, 0.0 }
 0x2de   :  { %v761_v43 = vmax.f32 %v725_v35, 0.0 }
 0x2df   :  { %v773_v44 = vpack.c.bf16 %v763_v39, %v762_v36 }
 0x2e0   :  { %v772_v45 = vpack.c.bf16 %v761_v43, %v760_v40 }
 0x2e2   :  { %1019 = vmatpush3.bf16.xpose.msra.mxu1 %v772_v45 }
 0x2e3   :  { %1020 = vmatprep.subr.bf16.mxu1 %v1128_v63 }
 0x2e8   :  { %v1008_v46 = vpop.f32.mrb[44].mxu0 }
 0x2e9   :  { %v746_v47 = vadd.f32 %v1008_v46, %v880_v1  ;;  %v737_v48 = vpop.f32.mrb[45].mxu0 }
 0x2ea   :  { %v738_v49 = vadd.f32 %v880_v1, %v737_v48  ;;  %v1009_v50 = vpop.f32.mrb[46].mxu0  ;;  %1021 = vmatpush3.bf16.xpose.msra.mxu1 %v773_v44 }
 0x2eb   :  { %v749_v51 = vadd.f32 %v1009_v50, %v880_v1  ;;  %v740_v52 = vpop.f32.mrb[47].mxu0  ;;  %1022 = vmatprep.subr.bf16.mxu1 %v1128_v63  ;;  %v766_v54 = vmax.f32 %v746_v47, 0.0 }
 0x2ec   :  { %v741_v53 = vadd.f32 %v880_v1, %v740_v52  ;;  %v764_v56 = vmax.f32 %v738_v49, 0.0 }
 0x2ed   :  { %v767_v55 = vmax.f32 %v749_v51, 0.0 }
 0x2ee   :  { %v765_v57 = vmax.f32 %v741_v53, 0.0 }
 0x2ef   :  { %v775_v58 = vpack.c.bf16 %v767_v55, %v766_v54 }
 0x2f0   :  { %v774_v59 = vpack.c.bf16 %v765_v57, %v764_v56 }
 0x2f2   :  { %1023 = vmatpush3.bf16.xpose.msra.mxu1 %v774_v59 }
 0x2f3   :  { %1024 = vmatprep.subr.bf16.mxu1 %v1128_v63 }
 0x2fa   :  { %1025 = vmatpush3.bf16.xpose.msra.mxu1 %v775_v58 }
 0x301   :  { %1027 = vmatmul.mubr.bf16.vlgmr.msra.gmra.mrb[32].mxu1 %v776_v60 }
 0x3d4   :  { %v821_v0 = vpop.f32.mrb[32].mxu1 }
 0x3d5   :  { %v822_v1 = vadd.f32 %v821_v0, %v786_v62  ;;  %v1028_v2 = vpop.f32.mrb[33].mxu1 }
 0x3d6   :  { %v824_v3 = vpop.f32.mrb[34].mxu1 }
 0x3d7   :  { %827 = vst [vmem:[#allocation6] sm:$0x1] %v822_v1  ;;  %v1029_v4 = vpop.f32.mrb[35].mxu1 }
 0x3d8   :  { %1109 = shalt.err (!%p1106_p12)
}
 0x3d9   :  { %s1110_s24 = scalar_lea.hbm %s1368_s9, 16 }
 0x3da   :  { %p1111_p13 = scmp.ne.s32.totalorder %s1368_s9, %s1110_s24  ;;  %p1114_p0 = scmp.lt.u32.totalorder %s1110_s24, %s1368_s9 }
 0x3dc   :  { %p1116_p1 = pnand %p1114_p0, %p1111_p13 }
 0x3de   :  { %1119 = shalt.err (!%p1116_p1)
}
 0x3df   :  { %837 = dma.vmem_to_hbm [thread:$0]  %s835_s20, 16, %s1368_s9, [#allocation5]  }
 0x3e0   :  { %1122 = dma.done.wait [#allocation5], 16  }
 0x3e1   :  { %1123 = vsyncadd [#allocation5], 4294967280 }
 0x3e2   :  { %841 = vsyncpa [#allocation4], 1 }
 0x3e3   :  { %842 = vsyncpa [#allocation5], 1 }

</bundles_post_ra>
